<compile_context>
chip_gen: v7x
topology: tpu7x:2x2x1
jax: 0.10.0
libtpu: 0.0.40
codegen_flags: <defaults>
</compile_context>

<pallas_src>
import jax
import jax.numpy as jnp
from jax import lax
from jax.experimental import pallas as pl
from jax.experimental.pallas import tpu as pltpu

_LANE = 128
_SUBLANE = 8


def _round_up(v, m):
    return ((v + m - 1) // m) * m


def _hnhn_fused_kernel(x_ref, w1_ref, b1_ref, w2_ref, b2_ref,
                       h_ref, inv_de_ref, inv_dv_ref, out_ref):
    """Two fused HNHNConv layers, fully VMEM-resident (padded N/E/C)."""
    h = h_ref[...]              # (Np, Ep) bf16 binary incidence matrix (loaded once)
    inv_de = inv_de_ref[...]    # (Ep, 1) f32 : 1 / edge degree
    inv_dv = inv_dv_ref[...]    # (Np, 1) f32 : 1 / vertex degree

    def conv(x_bf, w_ref, b_ref, relu):
        # Linear: (Np, Cin) @ (Cin, Cout) + (1, Cout); bf16 operands, f32 accumulation.
        xt = jnp.dot(x_bf, w_ref[...], preferred_element_type=jnp.float32)
        xt = xt + b_ref[...]
        # v2e mean: contract H's vertex axis with xt's vertex axis -> (Ep, Cout).
        # Transposed-LHS dot_general avoids materializing H^T via the XLU.
        y = lax.dot_general(h, xt.astype(jnp.bfloat16),
                            dimension_numbers=(((0,), (0,)), ((), ())),
                            preferred_element_type=jnp.float32)
        y = y * inv_de
        # e2v mean: (Np, Ep) @ (Ep, Cout) -> (Np, Cout).
        xo = jnp.dot(h, y.astype(jnp.bfloat16), preferred_element_type=jnp.float32)
        xo = xo * inv_dv
        if relu:
            xo = jnp.maximum(xo, 0.0)
        return xo

    x1 = conv(x_ref[...], w1_ref, b1_ref, relu=True)                # hidden layer
    x2 = conv(x1.astype(jnp.bfloat16), w2_ref, b2_ref, relu=False)  # output layer
    out_ref[...] = x2.astype(out_ref.dtype)


def hnhn_forward(x, h, params):
    """HNHN forward. x (N, Cin) f32, h (N, E) dense binary incidence matrix,
    params = ((w1, b1), (w2, b2)) with w (Cin, Cout), b (1, Cout) (already
    transposed from nn.Linear's (out, in)). Returns (N, num_classes) f32."""
    (w1, b1), (w2, b2) = params
    n, c_in = x.shape
    e = h.shape[1]
    c_hid = w1.shape[1]
    c_cls = w2.shape[1]

    # Lane/sublane-dense padded sizes.
    n_p = _round_up(n, _SUBLANE)
    e_p = _round_up(e, _LANE)
    c_in_p = _round_up(c_in, _LANE)
    c_p = _round_up(max(c_hid, c_cls), _LANE)

    # Mean-aggregation normalizers from the unpadded graph (exact f32), degree
    # clamped at 1 so isolated vertices/edges divide by 1.
    inv_de = 1.0 / jnp.maximum(h.sum(axis=0), 1.0)   # (E,)
    inv_dv = 1.0 / jnp.maximum(h.sum(axis=1), 1.0)   # (N,)

    # Zero-pad to lane-dense shapes; padded rows/cols contribute exact zeros.
    x_p = jnp.zeros((n_p, c_in_p), jnp.bfloat16).at[:n, :c_in].set(x.astype(jnp.bfloat16))
    h_p = jnp.zeros((n_p, e_p), jnp.bfloat16).at[:n, :e].set(h.astype(jnp.bfloat16))
    w1_p = jnp.zeros((c_in_p, c_p), jnp.bfloat16).at[:c_in, :c_hid].set(w1.astype(jnp.bfloat16))
    b1_p = jnp.zeros((1, c_p), jnp.float32).at[:, :c_hid].set(b1.astype(jnp.float32))
    w2_p = jnp.zeros((c_p, c_p), jnp.bfloat16).at[:c_hid, :c_cls].set(w2.astype(jnp.bfloat16))
    b2_p = jnp.zeros((1, c_p), jnp.float32).at[:, :c_cls].set(b2.astype(jnp.float32))
    inv_de_p = jnp.ones((e_p, 1), jnp.float32).at[:e, 0].set(inv_de)
    inv_dv_p = jnp.ones((n_p, 1), jnp.float32).at[:n, 0].set(inv_dv)

    flops = (2 * (n_p * c_in_p * c_p + 2 * n_p * e_p * c_p)      # layer 1
             + 2 * (n_p * c_p * c_p + 2 * n_p * e_p * c_p))      # layer 2
    bytes_accessed = (2 * (x_p.size + h_p.size + w1_p.size + w2_p.size)
                      + 4 * (b1_p.size + b2_p.size + inv_de_p.size + inv_dv_p.size)
                      + 4 * n_p * c_p)

    vmem = pl.BlockSpec(memory_space=pltpu.MemorySpace.VMEM)
    out_p = pl.pallas_call(
        _hnhn_fused_kernel,
        out_shape=jax.ShapeDtypeStruct((n_p, c_p), jnp.float32),
        in_specs=[vmem] * 8,
        out_specs=vmem,
        cost_estimate=pl.CostEstimate(flops=flops, transcendentals=0,
                                      bytes_accessed=bytes_accessed),
    )(x_p, w1_p, b1_p, w2_p, b2_p, h_p, inv_de_p, inv_dv_p)

    return out_p[:n, :c_cls]


def _reference(x, h, params):
    """Plain-JAX f32 reference for sanity check."""
    (w1, b1), (w2, b2) = params
    deg_e = jnp.maximum(h.sum(axis=0), 1.0)
    deg_v = jnp.maximum(h.sum(axis=1), 1.0)

    def layer(x, w, b, relu):
        xt = x @ w + b
        y = (h.T @ xt) / deg_e[:, None]
        xo = (h @ y) / deg_v[:, None]
        return jnp.maximum(xo, 0.0) if relu else xo

    return layer(layer(x, w1, b1, True), w2, b2, False)


if __name__ == "__main__":
    key = jax.random.PRNGKey(0)
    k_x, k_h, k_w1, k_b1, k_w2, k_b2 = jax.random.split(key, 6)

    N, E = 64, 32            # vertices, hyperedges
    C_in, C_hid, C_cls = 16, 32, 8

    # Input vertex features (N, C_in)
    x = jax.random.normal(k_x, (N, C_in), dtype=jnp.float32)

    # Dense binary incidence matrix H (N, E); ensure every vertex/edge has degree >= 1.
    h = (jax.random.uniform(k_h, (N, E)) < 0.2).astype(jnp.float32)
    h = h.at[jnp.arange(N), jnp.arange(N) % E].set(1.0)

    # Deterministic parameter init (nn.Linear shapes: W (out, in), b (out,));
    # pre-transposed W to (in, out) for the kernel.
    def init_linear(kw, kb, c_in, c_out):
        bound = 1.0 / jnp.sqrt(jnp.float32(c_in))
        w = jax.random.uniform(kw, (c_in, c_out), minval=-bound, maxval=bound,
                               dtype=jnp.float32)
        b = jax.random.uniform(kb, (1, c_out), minval=-bound, maxval=bound,
                               dtype=jnp.float32)
        return w, b

    params = (init_linear(k_w1, k_b1, C_in, C_hid),
              init_linear(k_w2, k_b2, C_hid, C_cls))

    out = jax.block_until_ready(jax.jit(hnhn_forward)(x, h, params))
    ref = _reference(x, h, params)

    assert out.shape == (N, C_cls), out.shape
    # bf16 matmul operands (f32 accumulation) -> loosened tolerance vs f32 reference.
    err = jnp.max(jnp.abs(out - ref))
    assert jnp.allclose(out, ref, atol=5e-2, rtol=5e-2), f"mismatch vs reference, max abs err {err}"
    print("KERNEL_OK")
</pallas_src>

<mosaic_0001>
module attributes {stable_mosaic.version = 11 : i64} {
  func.func @_hnhn_fused_kernel(%arg0: memref<64x128xbf16, #tpu.memory_space<vmem>>, %arg1: memref<128x128xbf16, #tpu.memory_space<vmem>>, %arg2: memref<1x128xf32, #tpu.memory_space<vmem>>, %arg3: memref<128x128xbf16, #tpu.memory_space<vmem>>, %arg4: memref<1x128xf32, #tpu.memory_space<vmem>>, %arg5: memref<64x128xbf16, #tpu.memory_space<vmem>>, %arg6: memref<128x1xf32, #tpu.memory_space<vmem>>, %arg7: memref<64x1xf32, #tpu.memory_space<vmem>>, %arg8: memref<64x128xf32, #tpu.memory_space<vmem>>) attributes {dimension_semantics = [], scalar_prefetch = 0 : i64, scratch_operands = 0 : i64, tpu.core_type = #tpu.core_type<tc>} {
    %c0 = arith.constant 0 : index
    %c0_0 = arith.constant 0 : index
    %0 = vector.load %arg5[%c0, %c0_0] : memref<64x128xbf16, #tpu.memory_space<vmem>>, vector<64x128xbf16>
    %c0_1 = arith.constant 0 : index
    %c0_2 = arith.constant 0 : index
    %1 = vector.load %arg6[%c0_1, %c0_2] : memref<128x1xf32, #tpu.memory_space<vmem>>, vector<128x1xf32>
    %c0_3 = arith.constant 0 : index
    %c0_4 = arith.constant 0 : index
    %2 = vector.load %arg7[%c0_3, %c0_4] : memref<64x1xf32, #tpu.memory_space<vmem>>, vector<64x1xf32>
    %c0_5 = arith.constant 0 : index
    %c0_6 = arith.constant 0 : index
    %3 = vector.load %arg0[%c0_5, %c0_6] : memref<64x128xbf16, #tpu.memory_space<vmem>>, vector<64x128xbf16>
    %c0_7 = arith.constant 0 : index
    %c0_8 = arith.constant 0 : index
    %4 = vector.load %arg1[%c0_7, %c0_8] : memref<128x128xbf16, #tpu.memory_space<vmem>>, vector<128x128xbf16>
    %cst = arith.constant dense<0.000000e+00> : vector<64x128xf32>
    %5 = tpu.matmul %3, %4, %cst {dimension_numbers = #tpu.dot_dimension_numbers<[1], [0], [0], [1], [0, 0, 1, 1], [], []>} : vector<64x128xbf16>, vector<128x128xbf16>, vector<64x128xf32> -> vector<64x128xf32>
    %c0_9 = arith.constant 0 : index
    %c0_10 = arith.constant 0 : index
    %6 = vector.load %arg2[%c0_9, %c0_10] : memref<1x128xf32, #tpu.memory_space<vmem>>, vector<1x128xf32>
    %7 = vector.broadcast %6 : vector<1x128xf32> to vector<64x128xf32>
    %8 = arith.addf %5, %7 : vector<64x128xf32>
    %9 = arith.truncf %8 : vector<64x128xf32> to vector<64x128xbf16>
    %cst_11 = arith.constant dense<0.000000e+00> : vector<128x128xf32>
    %10 = tpu.matmul %0, %9, %cst_11 {dimension_numbers = #tpu.dot_dimension_numbers<[0], [0], [1], [1], [0, 1, 1, 1], [], []>} : vector<64x128xbf16>, vector<64x128xbf16>, vector<128x128xf32> -> vector<128x128xf32>
    %11 = vector.broadcast %1 : vector<128x1xf32> to vector<128x128xf32>
    %12 = arith.mulf %10, %11 : vector<128x128xf32>
    %13 = arith.truncf %12 : vector<128x128xf32> to vector<128x128xbf16>
    %cst_12 = arith.constant dense<0.000000e+00> : vector<64x128xf32>
    %14 = tpu.matmul %0, %13, %cst_12 {dimension_numbers = #tpu.dot_dimension_numbers<[1], [0], [0], [1], [0, 0, 1, 1], [], []>} : vector<64x128xbf16>, vector<128x128xbf16>, vector<64x128xf32> -> vector<64x128xf32>
    %15 = vector.broadcast %2 : vector<64x1xf32> to vector<64x128xf32>
    %16 = arith.mulf %14, %15 : vector<64x128xf32>
    %cst_13 = arith.constant 0.000000e+00 : f32
    %17 = vector.broadcast %cst_13 : f32 to vector<64x128xf32>
    %18 = arith.maximumf %16, %17 : vector<64x128xf32>
    %19 = arith.truncf %18 : vector<64x128xf32> to vector<64x128xbf16>
    %c0_14 = arith.constant 0 : index
    %c0_15 = arith.constant 0 : index
    %20 = vector.load %arg3[%c0_14, %c0_15] : memref<128x128xbf16, #tpu.memory_space<vmem>>, vector<128x128xbf16>
    %cst_16 = arith.constant dense<0.000000e+00> : vector<64x128xf32>
    %21 = tpu.matmul %19, %20, %cst_16 {dimension_numbers = #tpu.dot_dimension_numbers<[1], [0], [0], [1], [0, 0, 1, 1], [], []>} : vector<64x128xbf16>, vector<128x128xbf16>, vector<64x128xf32> -> vector<64x128xf32>
    %c0_17 = arith.constant 0 : index
    %c0_18 = arith.constant 0 : index
    %22 = vector.load %arg4[%c0_17, %c0_18] : memref<1x128xf32, #tpu.memory_space<vmem>>, vector<1x128xf32>
    %23 = vector.broadcast %22 : vector<1x128xf32> to vector<64x128xf32>
    %24 = arith.addf %21, %23 : vector<64x128xf32>
    %25 = arith.truncf %24 : vector<64x128xf32> to vector<64x128xbf16>
    %cst_19 = arith.constant dense<0.000000e+00> : vector<128x128xf32>
    %26 = tpu.matmul %0, %25, %cst_19 {dimension_numbers = #tpu.dot_dimension_numbers<[0], [0], [1], [1], [0, 1, 1, 1], [], []>} : vector<64x128xbf16>, vector<64x128xbf16>, vector<128x128xf32> -> vector<128x128xf32>
    %27 = vector.broadcast %1 : vector<128x1xf32> to vector<128x128xf32>
    %28 = arith.mulf %26, %27 : vector<128x128xf32>
    %29 = arith.truncf %28 : vector<128x128xf32> to vector<128x128xbf16>
    %cst_20 = arith.constant dense<0.000000e+00> : vector<64x128xf32>
    %30 = tpu.matmul %0, %29, %cst_20 {dimension_numbers = #tpu.dot_dimension_numbers<[1], [0], [0], [1], [0, 0, 1, 1], [], []>} : vector<64x128xbf16>, vector<128x128xbf16>, vector<64x128xf32> -> vector<64x128xf32>
    %31 = vector.broadcast %2 : vector<64x1xf32> to vector<64x128xf32>
    %32 = arith.mulf %30, %31 : vector<64x128xf32>
    %c0_21 = arith.constant 0 : index
    %c0_22 = arith.constant 0 : index
    %33 = vector.load %arg8[%c0_21, %c0_22] : memref<64x128xf32, #tpu.memory_space<vmem>>, vector<64x128xf32>
    tpu.vector_store %arg8[%c0_21, %c0_22], %32 {strides = array<i32>} : memref<64x128xf32, #tpu.memory_space<vmem>>, vector<64x128xf32>,
    return
  }
}

</mosaic_0001>

<bundles_post_ra>
// kernel: hnhn_forward.1
= control target key start
LH: loop header
LB: loop body
LE: loop exit
PB: predicated region body
PF: predicated region fallthrough
CT: control target
= control target key end

     0   :  { %vm274_vm0 = vcmask 523264   ;;  %v1272_v17 = vmov 0   ;;  %s1656_s1 = inlined_call_operand.vmem [shape: bf16[128,128], index: 1, kind: input, shape index: {}]   ;;  %s1657_s0 = inlined_call_operand.vmem [shape: bf16[64,128], index: 0, kind: input, shape index: {}]   ;;  %s1658_s5 = inlined_call_operand.vmem [shape: bf16[64,128], index: 5, kind: input, shape index: {}]   ;;  %s1659_s6 = inlined_call_operand.vmem [shape: f32[128,1], index: 6, kind: input, shape index: {}]   ;;  %s1660_s7 = inlined_call_operand.vmem [shape: f32[64,1], index: 7, kind: input, shape index: {}]   ;;  %s1661_s2 = inlined_call_operand.vmem [shape: f32[1,128], index: 2, kind: input, shape index: {}]   ;;  %s1662_s3 = inlined_call_operand.vmem [shape: bf16[128,128], index: 3, kind: input, shape index: {}]   ;;  %s1663_s4 = inlined_call_operand.vmem [shape: f32[1,128], index: 4, kind: input, shape index: {}]   ;;  %s1664_s8 = inlined_call_operand.vmem [shape: f32[64,128], index: 8, kind: output, shape index: {}]  }
   0x1   :  { %v1248_v0 = vld [vmem:[%s1656_s1] sm:$0xff]   ;;  %v1249_v1 = vld [vmem:[%s1656_s1 + $0x8] sm:$0xff]   ;;  %v1250_v2 = vld [vmem:[%s1656_s1 + $0x10] sm:$0xff]   ;;  %1246 = vset.pattern.permute.xlu1 %v1272_v17 }
   0x2   :  { %1085 = vmatprep.subr.bf16.mxu0 %v1248_v0  ;;  %v1251_v3 = vld [vmem:[%s1656_s1 + $0x18] sm:$0xff]   ;;  %v1256_v4 = vld [vmem:[%s1657_s0] sm:$0xff]   ;;  %v1345_v7 = vld [vmem:[%s1658_s5 + $0x8] sm:$0xff]  }
   0x3   :  { %1086 = vmatpush3.bf16.msra.mxu0 %v1248_v0  ;;  %1101 = vmatprep.mubr.bf16.mxu0 %v1256_v4  ;;  %v1252_v5 = vld [vmem:[%s1656_s1 + $0x20] sm:$0xff]   ;;  %v1253_v8 = vld [vmem:[%s1656_s1 + $0x28] sm:$0xff]   ;;  %v1354_v9 = vld [vmem:[%s1658_s5 + $0x10] sm:$0xff]  }
   0x4   :  { %1087 = vmatprep.subr.bf16.mxu0 %v1249_v1  ;;  %v1339_v6 = vld [vmem:[%s1658_s5] sm:$0xff]   ;;  %v1254_v10 = vld [vmem:[%s1656_s1 + $0x30] sm:$0xff]   ;;  %v1363_v11 = vld [vmem:[%s1658_s5 + $0x18] sm:$0xff]  }
   0x5   :  { %258 = vxpose.xlu0.c.b16.start [1/4] (short) %v1339_v6, 128  ;;  %v1255_v12 = vld [vmem:[%s1656_s1 + $0x38] sm:$0xff]   ;;  %v1257_v13 = vld [vmem:[%s1657_s0 + $0x8] sm:$0xff]   ;;  %v1258_v14 = vld [vmem:[%s1657_s0 + $0x10] sm:$0xff]  }
   0x6   :  { %v1259_v15 = vld [vmem:[%s1657_s0 + $0x18] sm:$0xff]   ;;  %v38_v18 = vld [vmem:[%s1659_s6] sm:$0xff]  ;;  %v39_v19 = vld [vmem:[%s1659_s6 + $0x8] sm:$0xff] }
   0x7   :  { %1088 = vmatpush3.bf16.msra.mxu0 %v1249_v1  ;;  %398 = vperm.xlu1 %1246, %v38_v18   ;;  %v40_v20 = vld [vmem:[%s1659_s6 + $0x10] sm:$0xff]  ;;  %v41_v21 = vld [vmem:[%s1659_s6 + $0x18] sm:$0xff]  ;;  %v43_v22 = vld [vmem:[%s1659_s6 + $0x28] sm:$0xff] }
   0x8   :  { %1089 = vmatprep.subr.bf16.mxu0 %v1250_v2  ;;  %v44_v23 = vld [vmem:[%s1659_s6 + $0x30] sm:$0xff]  ;;  %v45_v24 = vld [vmem:[%s1659_s6 + $0x38] sm:$0xff]  ;;  %v46_v25 = vld [vmem:[%s1659_s6 + $0x40] sm:$0xff] }
   0x9   :  { %259 = vxpose.xlu0.c.b16.cont [2/4] (short) %v1345_v7, 128  ;;  %v42_v26 = vld [vmem:[%s1659_s6 + $0x20] sm:$0xff]  ;;  %v47_v28 = vld [vmem:[%s1659_s6 + $0x48] sm:$0xff]  ;;  %v52_v29 = vld [vmem:[%s1659_s6 + $0x70] sm:$0xff] }
   0xa   :  { %v50_v27 = vld [vmem:[%s1659_s6 + $0x60] sm:$0xff]  ;;  %v48_v30 = vld [vmem:[%s1659_s6 + $0x50] sm:$0xff]  ;;  %v49_v32 = vld [vmem:[%s1659_s6 + $0x58] sm:$0xff] }
   0xb   :  { %1090 = vmatpush3.bf16.msra.mxu0 %v1250_v2  ;;  %403 = vperm.xlu1 %1246, %v39_v19   ;;  %v54_v31 = vld [vmem:[%s1660_s7] sm:$0xff]  ;;  %v56_v33 = vld [vmem:[%s1660_s7 + $0x10] sm:$0xff]  ;;  %v51_v34 = vld [vmem:[%s1659_s6 + $0x68] sm:$0xff] }
   0xc   :  { %1091 = vmatprep.subr.bf16.mxu0 %v1251_v3  ;;  %v58_v35 = vld [vmem:[%s1660_s7 + $0x20] sm:$0xff]  ;;  %v53_v36 = vld [vmem:[%s1659_s6 + $0x78] sm:$0xff]  ;;  %v60_v37 = vld [vmem:[%s1660_s7 + $0x30] sm:$0xff] }
   0xd   :  { %260 = vxpose.xlu0.c.b16.cont [3/4] (short) %v1354_v9, 128  ;;  %v55_v38 = vld [vmem:[%s1660_s7 + $0x8] sm:$0xff]  ;;  %v57_v39 = vld [vmem:[%s1660_s7 + $0x18] sm:$0xff]  ;;  %v971_v43 = vld [vmem:[%s1661_s2] ss:$0 sm:$0xff] }
   0xe   :  { %v59_v40 = vld [vmem:[%s1660_s7 + $0x28] sm:$0xff]  ;;  %v61_v41 = vld [vmem:[%s1660_s7 + $0x38] sm:$0xff] }
   0xf   :  { %1092 = vmatpush3.bf16.msra.mxu0 %v1251_v3  ;;  %408 = vperm.xlu1 %1246, %v40_v20  }
  0x10   :  { %1093 = vmatprep.subr.bf16.mxu0 %v1252_v5 }
  0x11   :  { %261 = vxpose.xlu0.c.b16.end [4/4] (short) %v1363_v11, 128 }
  0x13   :  { %1094 = vmatpush3.bf16.msra.mxu0 %v1252_v5  ;;  %413 = vperm.xlu1 %1246, %v41_v21  }
  0x14   :  { %1095 = vmatprep.subr.bf16.mxu0 %v1253_v8 }
  0x17   :  { %1096 = vmatpush3.bf16.msra.mxu0 %v1253_v8  ;;  %423 = vperm.xlu1 %1246, %v43_v22   ;;  %v1264_v8 = vld [vmem:[%s1662_s3] sm:$0xff]  }
  0x18   :  { %1097 = vmatprep.subr.bf16.mxu0 %v1254_v10 }
  0x1a   :  { %1247 = vset.pattern.permute.xlu0 %v1272_v17 }
  0x1b   :  { %1098 = vmatpush3.bf16.msra.mxu0 %v1254_v10  ;;  %428 = vperm.xlu1 %1246, %v44_v23   ;;  %v1265_v10 = vld [vmem:[%s1662_s3 + $0x8] sm:$0xff]  }
  0x1c   :  { %1099 = vmatprep.subr.bf16.mxu0 %v1255_v12 }
  0x1f   :  { %1100 = vmatpush3.bf16.msra.mxu0 %v1255_v12  ;;  %433 = vperm.xlu1 %1246, %v45_v24   ;;  %v1266_v12 = vld [vmem:[%s1662_s3 + $0x10] sm:$0xff]  }
  0x20   :  { %1157 = vmatprep.subr.bf16.mxu0 %v1264_v8 }
  0x22   :  { %1102 = vmatmul.mubr.bf16.vlgmr.msra.gmra.mrb[0].mxu0 %v1257_v13  ;;  %v1267_v13 = vld [vmem:[%s1662_s3 + $0x18] sm:$0xff]  }
  0x23   :  { %1105 = vmatprep.mubr.bf16.mxu0 %v1258_v14  ;;  %438 = vperm.xlu1 %1246, %v46_v25   ;;  %v1268_v14 = vld [vmem:[%s1662_s3 + $0x20] sm:$0xff]  }
  0x24   :  { %1158 = vmatpush3.bf16.msra.mxu0 %v1264_v8 }
  0x25   :  { %1159 = vmatprep.subr.bf16.mxu0 %v1265_v10 }
  0x27   :  { %443 = vperm.xlu1 %1246, %v47_v28  }
  0x28   :  { %1160 = vmatpush3.bf16.msra.mxu0 %v1265_v10 }
  0x29   :  { %1161 = vmatprep.subr.bf16.mxu0 %v1266_v12 }
  0x2a   :  { %1106 = vmatmul.mubr.bf16.gmra.mrb[4].mxu0 %v1259_v15  ;;  %418 = vperm.xlu0 %1247, %v42_v26   ;;  %v1269_v15 = vld [vmem:[%s1662_s3 + $0x28] sm:$0xff]  }
  0x2b   :  { %448 = vperm.xlu1 %1246, %v48_v30  }
  0x2c   :  { %1162 = vmatpush3.bf16.msra.mxu0 %v1266_v12 }
  0x2d   :  { %1163 = vmatprep.subr.bf16.mxu0 %v1267_v13 }
  0x2e   :  { %458 = vperm.xlu0 %1247, %v50_v27  }
  0x2f   :  { %453 = vperm.xlu1 %1246, %v49_v32  }
  0x30   :  { %1164 = vmatpush3.bf16.msra.mxu0 %v1267_v13 }
  0x31   :  { %1165 = vmatprep.subr.bf16.mxu0 %v1268_v14 }
  0x32   :  { %468 = vperm.xlu0 %1247, %v52_v29  }
  0x33   :  { %463 = vperm.xlu1 %1246, %v51_v34  }
  0x34   :  { %1166 = vmatpush3.bf16.msra.mxu0 %v1268_v14 }
  0x35   :  { %1167 = vmatprep.subr.bf16.mxu0 %v1269_v15 }
  0x36   :  { %567 = vperm.xlu0 %1247, %v54_v31  }
  0x37   :  { %473 = vperm.xlu1 %1246, %v53_v36  }
  0x38   :  { %1168 = vmatpush3.bf16.msra.mxu0 %v1269_v15 }
  0x3a   :  { %577 = vperm.xlu0 %1247, %v56_v33  }
  0x3b   :  { %572 = vperm.xlu1 %1246, %v55_v38  }
  0x3e   :  { %587 = vperm.xlu0 %1247, %v58_v35  }
  0x3f   :  { %582 = vperm.xlu1 %1246, %v57_v39  }
  0x42   :  { %597 = vperm.xlu0 %1247, %v60_v37  }
  0x43   :  { %592 = vperm.xlu1 %1246, %v59_v40  }
  0x47   :  { %602 = vperm.xlu1 %1246, %v61_v41  }
  0x6b   :  { %v1378_v16 = vpop.trf.xlu0 }
  0x6c   :  { %1117 = vmatprep.mubr.msk.bf16.mxu1 %vm274_vm0, %v1378_v16 }
  0x6f   :  { %v1457_v54 = vpop.trf.xlu0 }
  0x73   :  { %v1459_v0 = vpop.trf.xlu0 }
  0x77   :  { %v1461_v1 = vpop.trf.xlu0 }
  0x7b   :  { %v1467_v2 = vpop.trf.xlu0 }
  0x7f   :  { %v1471_v3 = vpop.trf.xlu0 }
  0x83   :  { %v1475_v4 = vpop.trf.xlu0 }
  0x86   :  { %v1504_v17 = vpop.permute.xlu1 %398 }
  0x87   :  { %v1481_v5 = vpop.trf.xlu0 }
  0x8a   :  { %v1506_v18 = vpop.permute.xlu1 %403 }
  0x8e   :  { %v1508_v19 = vpop.permute.xlu1 %408 }
  0x92   :  { %v1510_v20 = vpop.permute.xlu1 %413 }
  0x96   :  { %v1512_v21 = vpop.permute.xlu1 %423 }
  0x9a   :  { %v1514_v22 = vpop.permute.xlu1 %428 }
  0x9e   :  { %v1516_v23 = vpop.permute.xlu1 %433 }
  0xa2   :  { %v1518_v24 = vpop.permute.xlu1 %438 }
  0xa6   :  { %v1520_v27 = vpop.permute.xlu1 %443 }
  0xa9   :  { %v1528_v40 = vpop.permute.xlu0 %418 }
  0xaa   :  { %v1526_v36 = vpop.permute.xlu1 %448 }
  0xf5   :  { %v1103_v42 = vpop.f32.mrb[0].mxu0 }
  0xf6   :  { %v199_v44 = vpop.f32.mrb[1].mxu0  ;;  %v208_v46 = vadd.f32 %v1103_v42, %v971_v43 }
  0xf7   :  { %v1104_v45 = vpop.f32.mrb[2].mxu0  ;;  %v200_v49 = vadd.f32 %v971_v43, %v199_v44 }
  0xf8   :  { %v211_v47 = vadd.f32 %v1104_v45, %v971_v43  ;;  %v202_v48 = vpop.f32.mrb[3].mxu0 }
  0xf9   :  { %v203_v50 = vadd.f32 %v971_v43, %v202_v48 }
  0xfa   :  { %v231_v51 = vpack.c.bf16 %v211_v47, %v208_v46  ;;  %v1534_v47 = vpop.permute.xlu1 %453 }
  0xfb   :  { %v230_v52 = vpack.c.bf16 %v203_v50, %v200_v49 }
  0xfd   :  { %v1107_v53 = vpop.f32.mrb[4].mxu0  ;;  %1109 = vmatprep.subr.bf16.mxu1 %v230_v52 }
  0xfe   :  { %v215_v55 = vpop.f32.mrb[5].mxu0  ;;  %1110 = vmatpush3.bf16.msra.mxu1 %v230_v52  ;;  %v224_v57 = vadd.f32 %v1107_v53, %v971_v43  ;;  %v1536_v52 = vpop.permute.xlu0 %458 }
  0xff   :  { %v1108_v56 = vpop.f32.mrb[6].mxu0  ;;  %1111 = vmatprep.subr.bf16.mxu1 %v231_v51  ;;  %v216_v60 = vadd.f32 %v971_v43, %v215_v55 }
 0x100   :  { %v227_v58 = vadd.f32 %v1108_v56, %v971_v43  ;;  %v218_v59 = vpop.f32.mrb[7].mxu0 }
 0x101   :  { %v219_v61 = vadd.f32 %v971_v43, %v218_v59 }
 0x102   :  { %v233_v62 = vpack.c.bf16 %v227_v58, %v224_v57  ;;  %1112 = vmatpush3.bf16.msra.mxu1 %v231_v51  ;;  %v1540_v57 = vpop.permute.xlu1 %463 }
 0x103   :  { %v232_v63 = vpack.c.bf16 %v219_v61, %v216_v60 }
 0x105   :  { %1113 = vmatprep.subr.bf16.mxu1 %v232_v63 }
 0x106   :  { %1114 = vmatpush3.bf16.msra.mxu1 %v232_v63  ;;  %v1544_v63 = vpop.permute.xlu0 %468  ;;  %v1546_v10 = vpop.permute.xlu1 %473 }
 0x107   :  { %1115 = vmatprep.subr.bf16.mxu1 %v233_v62 }
 0x10a   :  { %1116 = vmatpush3.bf16.msra.mxu1 %v233_v62 }
 0x10d   :  { %1118 = vmatmul.mubr.msk.bf16.vlgmr.msra.gmra.mrb[0].mxu1 %vm274_vm0, %v1457_v54 }
 0x10e   :  { %1121 = vmatprep.mubr.msk.bf16.mxu1 %vm274_vm0, %v1459_v0 }
 0x115   :  { %1122 = vmatmul.mubr.msk.bf16.gmra.mrb[4].mxu1 %vm274_vm0, %v1461_v1 }
 0x116   :  { %1125 = vmatprep.mubr.msk.bf16.mxu1 %vm274_vm0, %v1467_v2 }
 0x11d   :  { %1126 = vmatmul.mubr.msk.bf16.gmra.mrb[8].mxu1 %vm274_vm0, %v1471_v3 }
 0x11e   :  { %1129 = vmatprep.mubr.msk.bf16.mxu1 %vm274_vm0, %v1475_v4 }
 0x125   :  { %1130 = vmatmul.mubr.msk.bf16.gmra.mrb[12].mxu1 %vm274_vm0, %v1481_v5 }
 0x126   :  { %1149 = vmatprep.mubr.bf16.mxu1 %v1339_v6 }
 0x1e0   :  { %v1119_v25 = vpop.f32.mrb[0].mxu1 }
 0x1e1   :  { %v333_v26 = vpop.f32.mrb[1].mxu1  ;;  %v478_v29 = vmul.f32 %v1119_v25, %v1508_v19 }
 0x1e2   :  { %v1120_v28 = vpop.f32.mrb[2].mxu1  ;;  %v476_v32 = vmul.f32 %v1504_v17, %v333_v26 }
 0x1e3   :  { %v479_v30 = vmul.f32 %v1120_v28, %v1510_v20  ;;  %v336_v31 = vpop.f32.mrb[3].mxu1 }
 0x1e4   :  { %v477_v33 = vmul.f32 %v1506_v18, %v336_v31  ;;  %v1271_v31 = vld [vmem:[%s1662_s3 + $0x38] sm:$0xff]  }
 0x1e5   :  { %v493_v34 = vpack.c.bf16 %v479_v30, %v478_v29  ;;  %v1270_v30 = vld [vmem:[%s1662_s3 + $0x30] sm:$0xff]  }
 0x1e6   :  { %v492_v35 = vpack.c.bf16 %v477_v33, %v476_v32  ;;  %1169 = vmatprep.subr.bf16.mxu0 %v1270_v30  ;;  %v1563_v32 = vpop.permute.xlu0 %567  ;;  %v1565_v33 = vpop.permute.xlu1 %572 }
 0x1e7   :  { %1170 = vmatpush3.bf16.msra.mxu0 %v1270_v30 }
 0x1e8   :  { %v1123_v37 = vpop.f32.mrb[4].mxu1  ;;  %1133 = vmatprep.subr.bf16.mxu1 %v492_v35  ;;  %1171 = vmatprep.subr.bf16.mxu0 %v1271_v31 }
 0x1e9   :  { %v349_v38 = vpop.f32.mrb[5].mxu1  ;;  %1134 = vmatpush3.bf16.msra.mxu1 %v492_v35  ;;  %v482_v41 = vmul.f32 %v1123_v37, %v1514_v22 }
 0x1ea   :  { %v1124_v39 = vpop.f32.mrb[6].mxu1  ;;  %1135 = vmatprep.subr.bf16.mxu1 %v493_v34  ;;  %v480_v44 = vmul.f32 %v1528_v40, %v349_v38  ;;  %v1569_v35 = vpop.permute.xlu1 %582 }
 0x1eb   :  { %v483_v42 = vmul.f32 %v1124_v39, %v1516_v23  ;;  %v352_v43 = vpop.f32.mrb[7].mxu1  ;;  %1172 = vmatpush3.bf16.msra.mxu0 %v1271_v31 }
 0x1ec   :  { %v481_v45 = vmul.f32 %v1512_v21, %v352_v43 }
 0x1ed   :  { %v495_v46 = vpack.c.bf16 %v483_v42, %v482_v41  ;;  %1136 = vmatpush3.bf16.msra.mxu1 %v493_v34  ;;  %v1567_v34 = vpop.permute.xlu0 %577 }
 0x1ee   :  { %v494_v48 = vpack.c.bf16 %v481_v45, %v480_v44  ;;  %v1576_v45 = vpop.permute.xlu1 %592 }
 0x1f0   :  { %v1127_v49 = vpop.f32.mrb[8].mxu1  ;;  %1137 = vmatprep.subr.bf16.mxu1 %v494_v48 }
 0x1f1   :  { %v365_v50 = vpop.f32.mrb[9].mxu1  ;;  %1138 = vmatpush3.bf16.msra.mxu1 %v494_v48  ;;  %v486_v53 = vmul.f32 %v1127_v49, %v1526_v36  ;;  %v1572_v39 = vpop.permute.xlu0 %587 }
 0x1f2   :  { %v1128_v51 = vpop.f32.mrb[10].mxu1  ;;  %1139 = vmatprep.subr.bf16.mxu1 %v495_v46  ;;  %v484_v58 = vmul.f32 %v1518_v24, %v365_v50 }
 0x1f3   :  { %v487_v55 = vmul.f32 %v1128_v51, %v1534_v47  ;;  %v368_v56 = vpop.f32.mrb[11].mxu1 }
 0x1f4   :  { %v485_v59 = vmul.f32 %v1520_v27, %v368_v56 }
 0x1f5   :  { %v497_v60 = vpack.c.bf16 %v487_v55, %v486_v53  ;;  %1140 = vmatpush3.bf16.msra.mxu1 %v495_v46  ;;  %v1579_v55 = vpop.permute.xlu0 %597 }
 0x1f6   :  { %v496_v61 = vpack.c.bf16 %v485_v59, %v484_v58 }
 0x1f8   :  { %v1131_v62 = vpop.f32.mrb[12].mxu1  ;;  %1141 = vmatprep.subr.bf16.mxu1 %v496_v61 }
 0x1f9   :  { %v381_v8 = vpop.f32.mrb[13].mxu1  ;;  %1142 = vmatpush3.bf16.msra.mxu1 %v496_v61  ;;  %v490_v13 = vmul.f32 %v1131_v62, %v1544_v63  ;;  %v1582_v61 = vpop.permute.xlu1 %602 }
 0x1fa   :  { %v1132_v12 = vpop.f32.mrb[14].mxu1  ;;  %1143 = vmatprep.subr.bf16.mxu1 %v497_v60  ;;  %v488_v25 = vmul.f32 %v1536_v52, %v381_v8 }
 0x1fb   :  { %v491_v14 = vmul.f32 %v1132_v12, %v1546_v10  ;;  %v384_v15 = vpop.f32.mrb[15].mxu1 }
 0x1fc   :  { %v489_v26 = vmul.f32 %v1540_v57, %v384_v15 }
 0x1fd   :  { %v499_v28 = vpack.c.bf16 %v491_v14, %v490_v13  ;;  %1144 = vmatpush3.bf16.msra.mxu1 %v497_v60 }
 0x1fe   :  { %v498_v29 = vpack.c.bf16 %v489_v26, %v488_v25 }
 0x200   :  { %1145 = vmatprep.subr.bf16.mxu1 %v498_v29 }
 0x201   :  { %1146 = vmatpush3.bf16.msra.mxu1 %v498_v29 }
 0x202   :  { %1147 = vmatprep.subr.bf16.mxu1 %v499_v28 }
 0x205   :  { %1148 = vmatpush3.bf16.msra.mxu1 %v499_v28 }
 0x208   :  { %1150 = vmatmul.mubr.bf16.vlgmr.msra.gmra.mrb[16].mxu1 %v1345_v7 }
 0x209   :  { %1153 = vmatprep.mubr.bf16.mxu1 %v1354_v9 }
 0x210   :  { %1154 = vmatmul.mubr.bf16.gmra.mrb[20].mxu1 %v1363_v11 }
 0x211   :  { %1189 = vmatprep.mubr.msk.bf16.mxu1 %vm274_vm0, %v1378_v16 }
 0x2db   :  { %v1151_v16 = vpop.f32.mrb[16].mxu1 }
 0x2dc   :  { %v607_v37 = vmul.f32 %v1151_v16, %v1567_v34  ;;  %v534_v38 = vpop.f32.mrb[17].mxu1  ;;  %v996_v16 = vld [vmem:[%s1663_s4] ss:$0 sm:$0xff] }
 0x2dd   :  { %v605_v41 = vmul.f32 %v1563_v32, %v534_v38  ;;  %v1152_v42 = vpop.f32.mrb[18].mxu1 }
 0x2de   :  { %v608_v43 = vmul.f32 %v1152_v42, %v1569_v35  ;;  %v537_v44 = vpop.f32.mrb[19].mxu1  ;;  %v615_v48 = vmax.f32 %v607_v37, 0.0 }
 0x2df   :  { %v606_v46 = vmul.f32 %v1565_v33, %v537_v44  ;;  %v613_v50 = vmax.f32 %v605_v41, 0.0 }
 0x2e0   :  { %v616_v49 = vmax.f32 %v608_v43, 0.0 }
 0x2e1   :  { %v614_v51 = vmax.f32 %v606_v46, 0.0 }
 0x2e2   :  { %v622_v53 = vpack.c.bf16 %v616_v49, %v615_v48 }
 0x2e3   :  { %v621_v56 = vpack.c.bf16 %v614_v51, %v613_v50  ;;  %v1155_v58 = vpop.f32.mrb[20].mxu1 }
 0x2e4   :  { %v611_v59 = vmul.f32 %v1155_v58, %v1579_v55  ;;  %v550_v60 = vpop.f32.mrb[21].mxu1 }
 0x2e5   :  { %v609_v62 = vmul.f32 %v1572_v39, %v550_v60  ;;  %v1156_v8 = vpop.f32.mrb[22].mxu1  ;;  %1173 = vmatprep.mubr.bf16.mxu0 %v621_v56 }
 0x2e6   :  { %v612_v12 = vmul.f32 %v1156_v8, %v1582_v61  ;;  %v553_v13 = vpop.f32.mrb[23].mxu1  ;;  %1174 = vmatmul.mubr.bf16.vlgmr.msra.gmra.mrb[8].mxu0 %v622_v53  ;;  %v619_v15 = vmax.f32 %v611_v59, 0.0 }
 0x2e7   :  { %v610_v14 = vmul.f32 %v1576_v45, %v553_v13  ;;  %v617_v26 = vmax.f32 %v609_v62, 0.0 }
 0x2e8   :  { %v620_v25 = vmax.f32 %v612_v12, 0.0 }
 0x2e9   :  { %v618_v28 = vmax.f32 %v610_v14, 0.0 }
 0x2ea   :  { %v624_v29 = vpack.c.bf16 %v620_v25, %v619_v15 }
 0x2eb   :  { %v623_v30 = vpack.c.bf16 %v618_v28, %v617_v26 }
 0x2ed   :  { %1177 = vmatprep.mubr.bf16.mxu0 %v623_v30 }
 0x2ee   :  { %1178 = vmatmul.mubr.bf16.gmra.mrb[12].mxu0 %v624_v29 }
 0x2ef   :  { %1221 = vmatprep.mubr.bf16.mxu0 %v1339_v6 }
 0x3b9   :  { %v1175_v31 = vpop.f32.mrb[8].mxu0 }
 0x3ba   :  { %v730_v37 = vpop.f32.mrb[9].mxu0  ;;  %v739_v41 = vadd.f32 %v1175_v31, %v996_v16 }
 0x3bb   :  { %v1176_v38 = vpop.f32.mrb[10].mxu0  ;;  %v731_v44 = vadd.f32 %v996_v16, %v730_v37 }
 0x3bc   :  { %v742_v42 = vadd.f32 %v1176_v38, %v996_v16  ;;  %v733_v43 = vpop.f32.mrb[11].mxu0 }
 0x3bd   :  { %v734_v46 = vadd.f32 %v996_v16, %v733_v43 }
 0x3be   :  { %v762_v48 = vpack.c.bf16 %v742_v42, %v739_v41 }
 0x3bf   :  { %v761_v49 = vpack.c.bf16 %v734_v46, %v731_v44 }
 0x3c1   :  { %v1179_v50 = vpop.f32.mrb[12].mxu0  ;;  %1181 = vmatprep.subr.bf16.mxu1 %v761_v49 }
 0x3c2   :  { %v746_v51 = vpop.f32.mrb[13].mxu0  ;;  %1182 = vmatpush3.bf16.msra.mxu1 %v761_v49  ;;  %v755_v6 = vadd.f32 %v1179_v50, %v996_v16 }
 0x3c3   :  { %v1180_v53 = vpop.f32.mrb[14].mxu0  ;;  %1183 = vmatprep.subr.bf16.mxu1 %v762_v48  ;;  %v747_v59 = vadd.f32 %v996_v16, %v746_v51 }
 0x3c4   :  { %v758_v56 = vadd.f32 %v1180_v53, %v996_v16  ;;  %v749_v58 = vpop.f32.mrb[15].mxu0 }
 0x3c5   :  { %v750_v60 = vadd.f32 %v996_v16, %v749_v58 }
 0x3c6   :  { %v764_v62 = vpack.c.bf16 %v758_v56, %v755_v6  ;;  %1184 = vmatpush3.bf16.msra.mxu1 %v762_v48 }
 0x3c7   :  { %v763_v8 = vpack.c.bf16 %v750_v60, %v747_v59 }
 0x3c9   :  { %1185 = vmatprep.subr.bf16.mxu1 %v763_v8 }
 0x3ca   :  { %1186 = vmatpush3.bf16.msra.mxu1 %v763_v8 }
 0x3cb   :  { %1187 = vmatprep.subr.bf16.mxu1 %v764_v62 }
 0x3ce   :  { %1188 = vmatpush3.bf16.msra.mxu1 %v764_v62 }
 0x3d1   :  { %1190 = vmatmul.mubr.msk.bf16.vlgmr.msra.gmra.mrb[24].mxu1 %vm274_vm0, %v1457_v54 }
 0x3d2   :  { %1193 = vmatprep.mubr.msk.bf16.mxu1 %vm274_vm0, %v1459_v0 }
 0x3d9   :  { %1194 = vmatmul.mubr.msk.bf16.gmra.mrb[28].mxu1 %vm274_vm0, %v1461_v1 }
 0x3da   :  { %1197 = vmatprep.mubr.msk.bf16.mxu1 %vm274_vm0, %v1467_v2 }
 0x3e1   :  { %1198 = vmatmul.mubr.msk.bf16.gmra.mrb[32].mxu1 %vm274_vm0, %v1471_v3 }
 0x3e2   :  { %1201 = vmatprep.mubr.msk.bf16.mxu1 %vm274_vm0, %v1475_v4 }
 0x3e9   :  { %1202 = vmatmul.mubr.msk.bf16.gmra.mrb[36].mxu1 %vm274_vm0, %v1481_v5 }
 0x3ea   :  { %1225 = vmatprep.mubr.bf16.mxu1 %v1354_v9 }
 0x4a4   :  { %v1191_v54 = vpop.f32.mrb[24].mxu1 }
 0x4a5   :  { %v799_v12 = vpop.f32.mrb[25].mxu1  ;;  %v864_v13 = vmul.f32 %v1191_v54, %v1508_v19 }
 0x4a6   :  { %v1192_v0 = vpop.f32.mrb[26].mxu1  ;;  %v862_v2 = vmul.f32 %v799_v12, %v1504_v17 }
 0x4a7   :  { %v865_v1 = vmul.f32 %v1192_v0, %v1510_v20  ;;  %v802_v14 = vpop.f32.mrb[27].mxu1 }
 0x4a8   :  { %v863_v3 = vmul.f32 %v802_v14, %v1506_v18 }
 0x4a9   :  { %v879_v15 = vpack.c.bf16 %v865_v1, %v864_v13 }
 0x4aa   :  { %v878_v25 = vpack.c.bf16 %v863_v3, %v862_v2 }
 0x4ac   :  { %v1195_v4 = vpop.f32.mrb[28].mxu1  ;;  %1205 = vmatprep.subr.bf16.mxu0 %v878_v25  ;;  %1229 = vmatprep.subr.bf16.mxu1 %v878_v25 }
 0x4ad   :  { %v815_v5 = vpop.f32.mrb[29].mxu1  ;;  %1206 = vmatpush3.bf16.msra.mxu0 %v878_v25  ;;  %1237 = vmatpush3.bf16.msra.mxu1 %v878_v25  ;;  %v868_v19 = vmul.f32 %v1195_v4, %v1514_v22 }
 0x4ae   :  { %v1196_v9 = vpop.f32.mrb[30].mxu1  ;;  %1207 = vmatprep.subr.bf16.mxu0 %v879_v15  ;;  %1230 = vmatprep.subr.bf16.mxu1 %v879_v15  ;;  %v866_v17 = vmul.f32 %v815_v5, %v1528_v40 }
 0x4af   :  { %v869_v20 = vmul.f32 %v1196_v9, %v1516_v23  ;;  %v818_v26 = vpop.f32.mrb[31].mxu1 }
 0x4b0   :  { %v867_v18 = vmul.f32 %v818_v26, %v1512_v21 }
 0x4b1   :  { %v881_v28 = vpack.c.bf16 %v869_v20, %v868_v19  ;;  %1208 = vmatpush3.bf16.msra.mxu0 %v879_v15  ;;  %1238 = vmatpush3.bf16.msra.mxu1 %v879_v15 }
 0x4b2   :  { %v880_v29 = vpack.c.bf16 %v867_v18, %v866_v17 }
 0x4b4   :  { %v1199_v30 = vpop.f32.mrb[32].mxu1  ;;  %1209 = vmatprep.subr.bf16.mxu0 %v880_v29  ;;  %1231 = vmatprep.subr.bf16.mxu1 %v880_v29 }
 0x4b5   :  { %v831_v31 = vpop.f32.mrb[33].mxu1  ;;  %1210 = vmatpush3.bf16.msra.mxu0 %v880_v29  ;;  %1239 = vmatpush3.bf16.msra.mxu1 %v880_v29  ;;  %v872_v22 = vmul.f32 %v1199_v30, %v1526_v36 }
 0x4b6   :  { %v1200_v16 = vpop.f32.mrb[34].mxu1  ;;  %1211 = vmatprep.subr.bf16.mxu0 %v881_v28  ;;  %1232 = vmatprep.subr.bf16.mxu1 %v881_v28  ;;  %v870_v21 = vmul.f32 %v831_v31, %v1518_v24 }
 0x4b7   :  { %v873_v23 = vmul.f32 %v1200_v16, %v1534_v47  ;;  %v834_v40 = vpop.f32.mrb[35].mxu1 }
 0x4b8   :  { %v871_v37 = vmul.f32 %v834_v40, %v1520_v27 }
 0x4b9   :  { %v883_v38 = vpack.c.bf16 %v873_v23, %v872_v22  ;;  %1212 = vmatpush3.bf16.msra.mxu0 %v881_v28  ;;  %1240 = vmatpush3.bf16.msra.mxu1 %v881_v28 }
 0x4ba   :  { %v882_v41 = vpack.c.bf16 %v871_v37, %v870_v21 }
 0x4bc   :  { %v1203_v42 = vpop.f32.mrb[36].mxu1  ;;  %1213 = vmatprep.subr.bf16.mxu0 %v882_v41  ;;  %1233 = vmatprep.subr.bf16.mxu1 %v882_v41 }
 0x4bd   :  { %v847_v43 = vpop.f32.mrb[37].mxu1  ;;  %1214 = vmatpush3.bf16.msra.mxu0 %v882_v41  ;;  %1241 = vmatpush3.bf16.msra.mxu1 %v882_v41  ;;  %v876_v36 = vmul.f32 %v1203_v42, %v1544_v63 }
 0x4be   :  { %v1204_v44 = vpop.f32.mrb[38].mxu1  ;;  %1215 = vmatprep.subr.bf16.mxu0 %v883_v38  ;;  %1234 = vmatprep.subr.bf16.mxu1 %v883_v38  ;;  %v874_v27 = vmul.f32 %v847_v43, %v1536_v52 }
 0x4bf   :  { %v877_v47 = vmul.f32 %v1204_v44, %v1546_v10  ;;  %v850_v24 = vpop.f32.mrb[39].mxu1 }
 0x4c0   :  { %v875_v46 = vmul.f32 %v850_v24, %v1540_v57 }
 0x4c1   :  { %v885_v48 = vpack.c.bf16 %v877_v47, %v876_v36  ;;  %1216 = vmatpush3.bf16.msra.mxu0 %v883_v38  ;;  %1242 = vmatpush3.bf16.msra.mxu1 %v883_v38 }
 0x4c2   :  { %v884_v49 = vpack.c.bf16 %v875_v46, %v874_v27 }
 0x4c4   :  { %1217 = vmatprep.subr.bf16.mxu0 %v884_v49  ;;  %1235 = vmatprep.subr.bf16.mxu1 %v884_v49 }
 0x4c5   :  { %1218 = vmatpush3.bf16.msra.mxu0 %v884_v49  ;;  %1243 = vmatpush3.bf16.msra.mxu1 %v884_v49 }
 0x4c6   :  { %1219 = vmatprep.subr.bf16.mxu0 %v885_v48  ;;  %1236 = vmatprep.subr.bf16.mxu1 %v885_v48 }
 0x4c9   :  { %1220 = vmatpush3.bf16.msra.mxu0 %v885_v48  ;;  %1244 = vmatpush3.bf16.msra.mxu1 %v885_v48 }
 0x4cc   :  { %1222 = vmatmul.mubr.bf16.vlgmr.msra.gmra.mrb[16].mxu0 %v1345_v7  ;;  %1226 = vmatmul.mubr.bf16.vlgmr.msra.gmra.mrb[40].mxu1 %v1363_v11 }
 0x59f   :  { %v1223_v63 = vpop.f32.mrb[16].mxu0  ;;  %v1227_v52 = vpop.f32.mrb[40].mxu1 }
 0x5a0   :  { %v953_v57 = vmul.f32 %v1223_v63, %v1567_v34  ;;  %v957_v10 = vmul.f32 %v1227_v52, %v1579_v55  ;;  %v920_v50 = vpop.f32.mrb[17].mxu0  ;;  %v936_v51 = vpop.f32.mrb[41].mxu1 }
 0x5a1   :  { %v951_v53 = vmul.f32 %v920_v50, %v1563_v32  ;;  %v955_v6 = vmul.f32 %v936_v51, %v1572_v39  ;;  %v1224_v56 = vpop.f32.mrb[18].mxu0  ;;  %v1228_v58 = vpop.f32.mrb[42].mxu1 }
 0x5a2   :  { %961 = vst [vmem:[%s1664_s8 + $0x10] sm:$0xff] %v953_v57  ;;  %965 = vst [vmem:[%s1664_s8 + $0x30] sm:$0xff] %v957_v10  ;;  %v954_v7 = vmul.f32 %v1224_v56, %v1569_v35  ;;  %v958_v11 = vmul.f32 %v1228_v58, %v1582_v61  ;;  %v923_v34 = vpop.f32.mrb[19].mxu0  ;;  %v939_v55 = vpop.f32.mrb[43].mxu1 }
 0x5a3   :  { %959 = vst [vmem:[%s1664_s8] sm:$0xff] %v951_v53  ;;  %963 = vst [vmem:[%s1664_s8 + $0x20] sm:$0xff] %v955_v6  ;;  %v952_v32 = vmul.f32 %v923_v34, %v1565_v33  ;;  %v956_v39 = vmul.f32 %v939_v55, %v1576_v45 }
 0x5a4   :  { %962 = vst [vmem:[%s1664_s8 + $0x18] sm:$0xff] %v954_v7  ;;  %966 = vst [vmem:[%s1664_s8 + $0x38] sm:$0xff] %v958_v11 }
 0x5a5   :  { %960 = vst [vmem:[%s1664_s8 + $0x8] sm:$0xff] %v952_v32  ;;  %964 = vst [vmem:[%s1664_s8 + $0x28] sm:$0xff] %v956_v39 }

</bundles_post_ra>
